<compile_context>
chip_gen: v7x
topology: tpu7x:2x2x1
jax: 0.10.0
libtpu: 0.0.40
codegen_flags: <defaults>
</compile_context>

<pallas_src>
import functools

import jax
import jax.numpy as jnp
import numpy as np
from jax.experimental import pallas as pl
from jax.experimental.pallas import tpu as pltpu

# ---------------- small hparams consistent with the module ----------------
N_MELS = 16
REF_ENC_FILTERS = [8, 8, 16, 16]      # K = 4 conv layers
E = 32
REF_ENC_GRU_SIZE = E // 2             # 16
Z_LATENT_DIM = 16
BN_EPS = 1e-5


def _out_len(length):
    return (length - 3 + 2) // 2 + 1


# ============================ fused Pallas kernel ============================

def _vae_gst_kernel(
    x_ref,                                            # [1, H0, W0*C0] per-sample
    m1_ref, s1_ref, b1_ref,                           # conv1 (CoordConv) folded mats
    m2_ref, s2_ref, b2_ref,
    m3_ref, s3_ref, b3_ref,
    m4_ref, s4_ref, b4_ref,
    wih_ref, whh_ref, bih_ref, bhh_ref,               # GRU (gate-concat weights)
    f12w_ref, f12b_ref, f3w_ref, f3b_ref,             # VAE heads (fc1|fc2 concat, fc3)
    out_ref,                                          # [1, 1, E+3Z] packed output
    *, t_steps, hid, zdim):
  f32 = jnp.float32

  # Activation layout: [H, W*C] (time on sublanes, mel*channels lane-dense).
  y = x_ref[0]

  # ---- conv1..conv4: two matmuls per layer, no im2col / gather matrices ----
  for m_ref, s_ref, b_ref in ((m1_ref, s1_ref, b1_ref),
                              (m2_ref, s2_ref, b2_ref),
                              (m3_ref, s3_ref, b3_ref),
                              (m4_ref, s4_ref, b4_ref)):
    d_out = m_ref.shape[1] // 3
    # mel-axis conv (weights + BN scale folded) for the 3 time taps at once
    z3 = jnp.dot(y, m_ref[...], preferred_element_type=f32)      # [Hp, 3*Dout]
    # restack the three kh blocks row-wise so the time-axis tap selection +
    # summation is ONE 0/1 matmul instead of three
    zs = jnp.concatenate([z3[:, 0:d_out],
                          z3[:, d_out:2 * d_out],
                          z3[:, 2 * d_out:3 * d_out]], axis=0)    # [3*Hp, Dout]
    y = jnp.maximum(
        jnp.dot(s_ref[...], zs, preferred_element_type=f32) + b_ref[...], 0.0)

  # ---- GRU: x-projection hoisted out of the recurrence (all T at once) ----
  # y is [T', feat] with W'==1, matching PyTorch's [T, C*W'] feature order.
  gx = jnp.dot(y, wih_ref[...], preferred_element_type=f32) + bih_ref[...]   # [T', 3H]
  h = jnp.zeros((1, hid), f32)
  # TODO(synk): at large T' switch this static unroll to lax.fori_loop.
  for t in range(t_steps):
    gh = jnp.dot(h, whh_ref[...], preferred_element_type=f32) + bhh_ref[...]  # [1, 3H]
    gxt = gx[t:t + 1, :]
    r = jax.nn.sigmoid(gxt[:, 0:hid] + gh[:, 0:hid])
    zg = jax.nn.sigmoid(gxt[:, hid:2 * hid] + gh[:, hid:2 * hid])
    n = jnp.tanh(gxt[:, 2 * hid:3 * hid] + r * gh[:, 2 * hid:3 * hid])
    h = (1.0 - zg) * n + zg * h

  # ---- VAE heads: fc1|fc2 fused, eval-mode reparameterize (z = mu), fc3 ----
  mulv = jnp.dot(h, f12w_ref[...], preferred_element_type=f32) + f12b_ref[...]  # [1, 2Z]
  mu = mulv[:, 0:zdim]
  zvec = mu                                    # eval-mode reparameterize
  style = jnp.dot(zvec, f3w_ref[...], preferred_element_type=f32) + f3b_ref[...]  # [1, E]

  # single packed lane-dense writeback: [style | mu | logvar | z]
  out_ref[0] = jnp.concatenate([style, mulv, zvec], axis=-1)


def _full_spec(shape):
    nd = len(shape)
    return pl.BlockSpec(shape, lambda n, _nd=nd: (0,) * _nd)


def vae_gst_fused_call(x_rows, prep, t_steps):
    nb, h0, d0 = x_rows.shape
    hid = prep["whh"].shape[0]
    zdim = prep["f12w"].shape[1] // 2
    edim = prep["f3w"].shape[1]
    out_w = edim + 3 * zdim

    weights = (prep["m1"], prep["s1"], prep["b1"],
               prep["m2"], prep["s2"], prep["b2"],
               prep["m3"], prep["s3"], prep["b3"],
               prep["m4"], prep["s4"], prep["b4"],
               prep["wih"], prep["whh"], prep["bih"], prep["bhh"],
               prep["f12w"], prep["f12b"], prep["f3w"], prep["f3b"])

    in_specs = [pl.BlockSpec((1, h0, d0), lambda n: (n, 0, 0))]
    in_specs += [_full_spec(w.shape) for w in weights]
    out_spec = pl.BlockSpec((1, 1, out_w), lambda n: (n, 0, 0))

    # advisory cost estimate so XLA schedules surrounding glue around the call
    flops = 0
    for l in range(1, 5):
        m = prep[f"m{l}"]
        s = prep[f"s{l}"]
        hp = s.shape[1] // 3
        hl = s.shape[0]
        flops += 2 * hp * m.shape[0] * m.shape[1]            # y @ Mcat
        flops += 2 * hl * s.shape[1] * (m.shape[1] // 3)     # S @ zs
    flops += 2 * t_steps * prep["wih"].shape[0] * prep["wih"].shape[1]
    flops += t_steps * 2 * hid * prep["whh"].shape[1]
    flops += 2 * hid * 2 * zdim + 2 * zdim * edim
    flops *= nb
    bytes_accessed = (x_rows.size * 4 + sum(int(w.size) * 4 for w in weights)
                      + nb * out_w * 4)
    transcendentals = nb * t_steps * 3 * hid

    return pl.pallas_call(
        functools.partial(_vae_gst_kernel, t_steps=t_steps, hid=hid, zdim=zdim),
        out_shape=jax.ShapeDtypeStruct((nb, 1, out_w), jnp.float32),
        grid=(nb,),
        in_specs=in_specs,
        out_specs=out_spec,
        compiler_params=pltpu.CompilerParams(
            dimension_semantics=("parallel",),       # batch-parallel (v7x megacore)
            vmem_limit_bytes=32 * 1024 * 1024),      # footprint << 1 MiB on all gens
        cost_estimate=pl.CostEstimate(flops=int(flops),
                                      transcendentals=int(transcendentals),
                                      bytes_accessed=int(bytes_accessed)),
    )(x_rows, *weights)


# ============================ host-side preparation ============================

def add_coords_with_r(x):
    """CoordConv AddCoords (rank=2, with_r=True). x: [N, C, H, W] NCHW."""
    nb, _, hd, wd = x.shape
    xx = jnp.broadcast_to(jnp.arange(hd, dtype=jnp.float32)[:, None], (hd, wd))
    yy = jnp.broadcast_to(jnp.arange(wd, dtype=jnp.float32)[None, :], (hd, wd))
    xx = xx / max(hd - 1, 1) * 2.0 - 1.0
    yy = yy / max(wd - 1, 1) * 2.0 - 1.0
    rr = jnp.sqrt((xx - 0.5) ** 2 + (yy - 0.5) ** 2)
    coords = jnp.stack([xx, yy, rr], axis=0)[None]                 # [1, 3, H, W]
    coords = jnp.broadcast_to(coords, (nb, 3, hd, wd))
    return jnp.concatenate([x, coords], axis=1)


def _fold_bn(b, gamma, beta, rmean, rvar):
    inv_std = 1.0 / jnp.sqrt(rvar + BN_EPS)
    scale = gamma * inv_std
    shift = beta + (b - rmean) * scale
    return scale, shift


def build_conv_mats(w, scale, h_in, w_in):
    """Fold a 3x3 / stride-2 / pad-1 conv (+ folded BN scale) into:
         Mcat  [W_in*C_in, 3*W_out*C_out] -- mel-axis conv as a dense matmul,
                                             one column block per time tap kh;
         S     [H_out, 3*H_in]            -- 0/1 time-axis row selection/summation.
       Out-of-bounds taps are simply absent (== zero padding)."""
    c_out, c_in = w.shape[0], w.shape[1]
    h_out, w_out = _out_len(h_in), _out_len(w_in)
    d_out = w_out * c_out
    ws = w * scale[:, None, None, None]
    m = np.zeros((w_in * c_in, 3 * d_out), np.float32)
    for kh in range(3):
        for wo in range(w_out):
            for kw in range(3):
                wi = 2 * wo - 1 + kw
                if wi < 0 or wi >= w_in:
                    continue
                m[wi * c_in:(wi + 1) * c_in,
                  kh * d_out + wo * c_out: kh * d_out + (wo + 1) * c_out] = \
                    ws[:, :, kh, kw].T
    s = np.zeros((h_out, 3 * h_in), np.float32)
    for kh in range(3):
        for ho in range(h_out):
            hi = 2 * ho - 1 + kh
            if 0 <= hi < h_in:
                s[ho, kh * h_in + hi] = 1.0
    return m, s, h_out, w_out


def prepare_params(params, t_in):
    """Derive the fused-kernel operands (per-sample, no gather matrices)."""
    convs = params["convs"]
    assert len(convs) == 4, "fused kernel is written for 4 conv layers"
    prep = {}
    h_cur, w_cur = t_in, N_MELS
    for li, (w, b, ga, be, rm, rv) in enumerate(convs):
        scale, shift = _fold_bn(b, ga, be, rm, rv)
        m, s, h_cur, w_cur = build_conv_mats(np.asarray(w), np.asarray(scale),
                                             h_cur, w_cur)
        prep[f"m{li + 1}"] = jnp.asarray(m)
        prep[f"s{li + 1}"] = jnp.asarray(s)
        # additive BN shift tiled over the mel positions: index = wo*C + co
        prep[f"b{li + 1}"] = jnp.asarray(np.tile(np.asarray(shift), w_cur))[None, :]

    # GRU: gate-concatenated weights (r|z|n along the 3H lane axis)
    prep["wih"] = params["w_ih_t"]          # [I, 3H]
    prep["whh"] = params["w_hh_t"]          # [H, 3H]
    prep["bih"] = params["b_ih"]            # [1, 3H]
    prep["bhh"] = params["b_hh"]            # [1, 3H]

    # VAE heads: fc1 | fc2 concatenated along the output axis
    prep["f12w"] = jnp.concatenate([params["fc1_w"], params["fc2_w"]], axis=1)
    prep["f12b"] = jnp.concatenate([params["fc1_b"], params["fc2_b"]], axis=1)
    prep["f3w"] = params["fc3_w"]
    prep["f3b"] = params["fc3_b"]
    return prep


def vae_gst_forward(inputs, prep):
    """inputs: [N, Ty/r, n_mels*r] -> (style[N,E], mu[N,Z], logvar[N,Z], z[N,Z])."""
    nb = inputs.shape[0]
    x = inputs.reshape(nb, 1, -1, N_MELS)             # [N, 1, T, n_mels] NCHW
    x = add_coords_with_r(x)                          # CoordConv2d(with_r=True) layer 1
    c0, h0, w0 = x.shape[1], x.shape[2], x.shape[3]
    # channels-last rows [N, T, n_mels*C]; feature order (w, c) matches Mcat rows
    x_rows = jnp.transpose(x, (0, 2, 3, 1)).reshape(nb, h0, w0 * c0)

    h_dim, w_dim = h0, w0
    for _ in REF_ENC_FILTERS:
        h_dim, w_dim = _out_len(h_dim), _out_len(w_dim)
    # TODO(synk): if the mel axis does not reduce to 1, GRU features need (C, W')
    # regrouping; not required for these hparams (16 mels, 4 stride-2 convs).
    assert w_dim == 1, "fused kernel assumes the mel axis reduces to 1"

    packed = vae_gst_fused_call(x_rows, prep, h_dim).reshape(nb, -1)
    style = packed[:, :E]
    mu = packed[:, E:E + Z_LATENT_DIM]
    logvar = packed[:, E + Z_LATENT_DIM:E + 2 * Z_LATENT_DIM]
    z = packed[:, E + 2 * Z_LATENT_DIM:E + 3 * Z_LATENT_DIM]
    return style, mu, logvar, z


# ============================ params & reference ============================

def init_params(key):
    K = len(REF_ENC_FILTERS)
    filters = [1] + REF_ENC_FILTERS
    out_channels = N_MELS
    for _ in range(K):
        out_channels = _out_len(out_channels)
    gru_input = REF_ENC_FILTERS[-1] * out_channels
    H = REF_ENC_GRU_SIZE

    keys = iter(jax.random.split(key, 64))

    def nrm(shape, scale=0.1):
        return scale * jax.random.normal(next(keys), shape, dtype=jnp.float32)

    convs = []
    for i in range(K):
        cin = filters[i] + (3 if i == 0 else 0)      # AddCoords: +xx, +yy, +r
        cout = filters[i + 1]
        convs.append((nrm((cout, cin, 3, 3)),        # conv weight
                      nrm((cout,)),                  # conv bias
                      1.0 + nrm((cout,)),            # bn gamma
                      nrm((cout,)),                  # bn beta
                      nrm((cout,)),                  # bn running_mean
                      1.0 + jnp.abs(nrm((cout,)))))  # bn running_var

    w_ih = nrm((3 * H, gru_input))
    w_hh = nrm((3 * H, H))
    b_ih = nrm((3 * H,))
    b_hh = nrm((3 * H,))

    fc1_w = nrm((Z_LATENT_DIM, REF_ENC_GRU_SIZE)); fc1_b = nrm((Z_LATENT_DIM,))
    fc2_w = nrm((Z_LATENT_DIM, REF_ENC_GRU_SIZE)); fc2_b = nrm((Z_LATENT_DIM,))
    fc3_w = nrm((E, Z_LATENT_DIM)); fc3_b = nrm((E,))

    return dict(
        convs=convs,
        w_ih_t=w_ih.T, w_hh_t=w_hh.T,
        b_ih=b_ih[None, :], b_hh=b_hh[None, :],
        fc1_w=fc1_w.T, fc1_b=fc1_b[None, :],
        fc2_w=fc2_w.T, fc2_b=fc2_b[None, :],
        fc3_w=fc3_w.T, fc3_b=fc3_b[None, :],
    )


def im2col_3x3_s2_p1(x):
    """3x3 conv, stride 2, padding 1 patches. x: [N,C,H,W] -> ([N*Ho*Wo, C*9], Ho, Wo)."""
    nb, c, hd, wd = x.shape
    ho = (hd - 1) // 2 + 1
    wo = (wd - 1) // 2 + 1
    xp = jnp.pad(x, ((0, 0), (0, 0), (1, 1), (1, 1)))
    taps = []
    for kh in range(3):
        for kw in range(3):
            taps.append(xp[:, :, kh:kh + 2 * (ho - 1) + 1:2, kw:kw + 2 * (wo - 1) + 1:2])
    cols = jnp.stack(taps, axis=2)              # [N, C, 9, Ho, Wo]
    cols = cols.reshape(nb, c * 9, ho, wo)
    patches = cols.transpose(0, 2, 3, 1).reshape(nb * ho * wo, c * 9)
    return patches, ho, wo


def ref_forward(inputs, params):
    """Pure-JAX reference of the same forward pass (no Pallas)."""
    nb = inputs.shape[0]
    out = inputs.reshape(nb, 1, -1, N_MELS)
    for i, (w, b, gamma, beta, rmean, rvar) in enumerate(params["convs"]):
        if i == 0:
            out = add_coords_with_r(out)
        patches, ho, wo = im2col_3x3_s2_p1(out)
        cout = w.shape[0]
        w_mat = w.reshape(cout, -1).T
        scale, shift = _fold_bn(b, gamma, beta, rmean, rvar)
        y = jnp.maximum(patches @ w_mat * scale + shift, 0.0)
        out = y.reshape(nb, ho, wo, cout).transpose(0, 3, 1, 2)
    nb, c, tp, wp = out.shape
    seq = out.transpose(0, 2, 1, 3).reshape(nb, tp, c * wp)
    H = REF_ENC_GRU_SIZE
    h = jnp.zeros((nb, H), jnp.float32)
    for t in range(tp):
        x = seq[:, t, :]
        gx = x @ params["w_ih_t"] + params["b_ih"]
        gh = h @ params["w_hh_t"] + params["b_hh"]
        r = jax.nn.sigmoid(gx[:, :H] + gh[:, :H])
        zg = jax.nn.sigmoid(gx[:, H:2 * H] + gh[:, H:2 * H])
        n = jnp.tanh(gx[:, 2 * H:] + r * gh[:, 2 * H:])
        h = (1.0 - zg) * n + zg * h
    mu = h @ params["fc1_w"] + params["fc1_b"]
    logvar = h @ params["fc2_w"] + params["fc2_b"]
    z = mu
    style = z @ params["fc3_w"] + params["fc3_b"]
    return style, mu, logvar, z


# ============================ main ============================

if __name__ == "__main__":
    key = jax.random.PRNGKey(0)
    k_in, k_p = jax.random.split(key)
    inputs = jax.random.normal(k_in, (2, 32, N_MELS), dtype=jnp.float32)  # [N, T, n_mels]
    params = init_params(k_p)
    t_in = inputs.shape[1] * inputs.shape[2] // N_MELS
    prep = prepare_params(params, t_in=t_in)

    fwd = jax.jit(vae_gst_forward)
    style, mu, logvar, z = jax.block_until_ready(fwd(inputs, prep))

    # correctness against pure-JAX reference
    ref = ref_forward(inputs, params)
    for got, want in zip((style, mu, logvar, z), ref):
        np.testing.assert_allclose(np.asarray(got), np.asarray(want),
                                   rtol=1e-2, atol=1e-2)

    assert style.shape == (2, E) and mu.shape == (2, Z_LATENT_DIM)
    assert logvar.shape == (2, Z_LATENT_DIM) and z.shape == (2, Z_LATENT_DIM)
    print("KERNEL_OK")
</pallas_src>

<mosaic_0001>
module attributes {stable_mosaic.version = 11 : i64} {
  func.func @_vae_gst_kernel(%arg0: i32, %arg1: memref<1x32x64xf32, #tpu.memory_space<vmem>>, %arg2: memref<64x192xf32, #tpu.memory_space<vmem>>, %arg3: memref<16x96xf32, #tpu.memory_space<vmem>>, %arg4: memref<1x64xf32, #tpu.memory_space<vmem>>, %arg5: memref<64x96xf32, #tpu.memory_space<vmem>>, %arg6: memref<8x48xf32, #tpu.memory_space<vmem>>, %arg7: memref<1x32xf32, #tpu.memory_space<vmem>>, %arg8: memref<32x96xf32, #tpu.memory_space<vmem>>, %arg9: memref<4x24xf32, #tpu.memory_space<vmem>>, %arg10: memref<1x32xf32, #tpu.memory_space<vmem>>, %arg11: memref<32x48xf32, #tpu.memory_space<vmem>>, %arg12: memref<2x12xf32, #tpu.memory_space<vmem>>, %arg13: memref<1x16xf32, #tpu.memory_space<vmem>>, %arg14: memref<16x48xf32, #tpu.memory_space<vmem>>, %arg15: memref<16x48xf32, #tpu.memory_space<vmem>>, %arg16: memref<1x48xf32, #tpu.memory_space<vmem>>, %arg17: memref<1x48xf32, #tpu.memory_space<vmem>>, %arg18: memref<16x32xf32, #tpu.memory_space<vmem>>, %arg19: memref<1x32xf32, #tpu.memory_space<vmem>>, %arg20: memref<16x32xf32, #tpu.memory_space<vmem>>, %arg21: memref<1x32xf32, #tpu.memory_space<vmem>>, %arg22: memref<1x1x80xf32, #tpu.memory_space<vmem>>) attributes {dimension_semantics = [#tpu.dimension_semantics<parallel>], iteration_bounds = array<i64: 2>, scalar_prefetch = 0 : i64, scratch_operands = 0 : i64, tpu.core_type = #tpu.core_type<tc>, window_params = [{transform_indices = @transform_0, window_bounds = array<i64: 1, 32, 64>}, {pipeline_mode = #tpu.pipeline_mode<synchronous>, transform_indices = @transform_1, window_bounds = array<i64: 64, 192>}, {pipeline_mode = #tpu.pipeline_mode<synchronous>, transform_indices = @transform_2, window_bounds = array<i64: 16, 96>}, {pipeline_mode = #tpu.pipeline_mode<synchronous>, transform_indices = @transform_3, window_bounds = array<i64: 1, 64>}, {pipeline_mode = #tpu.pipeline_mode<synchronous>, transform_indices = @transform_4, window_bounds = array<i64: 64, 96>}, {pipeline_mode = #tpu.pipeline_mode<synchronous>, transform_indices = @transform_5, window_bounds = array<i64: 8, 48>}, {pipeline_mode = #tpu.pipeline_mode<synchronous>, transform_indices = @transform_6, window_bounds = array<i64: 1, 32>}, {pipeline_mode = #tpu.pipeline_mode<synchronous>, transform_indices = @transform_7, window_bounds = array<i64: 32, 96>}, {pipeline_mode = #tpu.pipeline_mode<synchronous>, transform_indices = @transform_8, window_bounds = array<i64: 4, 24>}, {pipeline_mode = #tpu.pipeline_mode<synchronous>, transform_indices = @transform_9, window_bounds = array<i64: 1, 32>}, {pipeline_mode = #tpu.pipeline_mode<synchronous>, transform_indices = @transform_10, window_bounds = array<i64: 32, 48>}, {pipeline_mode = #tpu.pipeline_mode<synchronous>, transform_indices = @transform_11, window_bounds = array<i64: 2, 12>}, {pipeline_mode = #tpu.pipeline_mode<synchronous>, transform_indices = @transform_12, window_bounds = array<i64: 1, 16>}, {pipeline_mode = #tpu.pipeline_mode<synchronous>, transform_indices = @transform_13, window_bounds = array<i64: 16, 48>}, {pipeline_mode = #tpu.pipeline_mode<synchronous>, transform_indices = @transform_14, window_bounds = array<i64: 16, 48>}, {pipeline_mode = #tpu.pipeline_mode<synchronous>, transform_indices = @transform_15, window_bounds = array<i64: 1, 48>}, {pipeline_mode = #tpu.pipeline_mode<synchronous>, transform_indices = @transform_16, window_bounds = array<i64: 1, 48>}, {pipeline_mode = #tpu.pipeline_mode<synchronous>, transform_indices = @transform_17, window_bounds = array<i64: 16, 32>}, {pipeline_mode = #tpu.pipeline_mode<synchronous>, transform_indices = @transform_18, window_bounds = array<i64: 1, 32>}, {pipeline_mode = #tpu.pipeline_mode<synchronous>, transform_indices = @transform_19, window_bounds = array<i64: 16, 32>}, {pipeline_mode = #tpu.pipeline_mode<synchronous>, transform_indices = @transform_20, window_bounds = array<i64: 1, 32>}, {transform_indices = @transform_21, window_bounds = array<i64: 1, 1, 80>}]} {
    %c0 = arith.constant 0 : index
    %c0_0 = arith.constant 0 : index
    %c0_1 = arith.constant 0 : index
    %0 = vector.load %arg1[%c0, %c0_0, %c0_1] : memref<1x32x64xf32, #tpu.memory_space<vmem>>, vector<1x32x64xf32>
    %1 = vector.shape_cast %0 : vector<1x32x64xf32> to vector<32x64xf32>
    %c0_2 = arith.constant 0 : index
    %c0_3 = arith.constant 0 : index
    %2 = vector.load %arg2[%c0_2, %c0_3] : memref<64x192xf32, #tpu.memory_space<vmem>>, vector<64x192xf32>
    %cst = arith.constant dense<0.000000e+00> : vector<32x192xf32>
    %3 = tpu.matmul %1, %2, %cst {dimension_numbers = #tpu.dot_dimension_numbers<[1], [0], [0], [1], [0, 0, 1, 1], [], []>} : vector<32x64xf32>, vector<64x192xf32>, vector<32x192xf32> -> vector<32x192xf32>
    %4 = vector.extract_strided_slice %3 {offsets = [0, 0], sizes = [32, 64], strides = [1, 1]} : vector<32x192xf32> to vector<32x64xf32>
    %5 = vector.extract_strided_slice %3 {offsets = [0, 64], sizes = [32, 64], strides = [1, 1]} : vector<32x192xf32> to vector<32x64xf32>
    %6 = vector.extract_strided_slice %3 {offsets = [0, 128], sizes = [32, 64], strides = [1, 1]} : vector<32x192xf32> to vector<32x64xf32>
    %7 = tpu.concatenate %4, %5, %6 in 0 : vector<32x64xf32>, vector<32x64xf32>, vector<32x64xf32> -> vector<96x64xf32>
    %c0_4 = arith.constant 0 : index
    %c0_5 = arith.constant 0 : index
    %8 = vector.load %arg3[%c0_4, %c0_5] : memref<16x96xf32, #tpu.memory_space<vmem>>, vector<16x96xf32>
    %cst_6 = arith.constant dense<0.000000e+00> : vector<16x64xf32>
    %9 = tpu.matmul %8, %7, %cst_6 {dimension_numbers = #tpu.dot_dimension_numbers<[1], [0], [0], [1], [0, 0, 1, 1], [], []>} : vector<16x96xf32>, vector<96x64xf32>, vector<16x64xf32> -> vector<16x64xf32>
    %c0_7 = arith.constant 0 : index
    %c0_8 = arith.constant 0 : index
    %10 = vector.load %arg4[%c0_7, %c0_8] : memref<1x64xf32, #tpu.memory_space<vmem>>, vector<1x64xf32>
    %11 = vector.broadcast %10 : vector<1x64xf32> to vector<16x64xf32>
    %12 = arith.addf %9, %11 : vector<16x64xf32>
    %cst_9 = arith.constant 0.000000e+00 : f32
    %13 = vector.broadcast %cst_9 : f32 to vector<16x64xf32>
    %14 = arith.maximumf %12, %13 : vector<16x64xf32>
    %c0_10 = arith.constant 0 : index
    %c0_11 = arith.constant 0 : index
    %15 = vector.load %arg5[%c0_10, %c0_11] : memref<64x96xf32, #tpu.memory_space<vmem>>, vector<64x96xf32>
    %cst_12 = arith.constant dense<0.000000e+00> : vector<16x96xf32>
    %16 = tpu.matmul %14, %15, %cst_12 {dimension_numbers = #tpu.dot_dimension_numbers<[1], [0], [0], [1], [0, 0, 1, 1], [], []>} : vector<16x64xf32>, vector<64x96xf32>, vector<16x96xf32> -> vector<16x96xf32>
    %17 = vector.extract_strided_slice %16 {offsets = [0, 0], sizes = [16, 32], strides = [1, 1]} : vector<16x96xf32> to vector<16x32xf32>
    %18 = vector.extract_strided_slice %16 {offsets = [0, 32], sizes = [16, 32], strides = [1, 1]} : vector<16x96xf32> to vector<16x32xf32>
    %19 = vector.extract_strided_slice %16 {offsets = [0, 64], sizes = [16, 32], strides = [1, 1]} : vector<16x96xf32> to vector<16x32xf32>
    %20 = tpu.concatenate %17, %18, %19 in 0 : vector<16x32xf32>, vector<16x32xf32>, vector<16x32xf32> -> vector<48x32xf32>
    %c0_13 = arith.constant 0 : index
    %c0_14 = arith.constant 0 : index
    %21 = vector.load %arg6[%c0_13, %c0_14] : memref<8x48xf32, #tpu.memory_space<vmem>>, vector<8x48xf32>
    %cst_15 = arith.constant dense<0.000000e+00> : vector<8x32xf32>
    %22 = tpu.matmul %21, %20, %cst_15 {dimension_numbers = #tpu.dot_dimension_numbers<[1], [0], [0], [1], [0, 0, 1, 1], [], []>} : vector<8x48xf32>, vector<48x32xf32>, vector<8x32xf32> -> vector<8x32xf32>
    %c0_16 = arith.constant 0 : index
    %c0_17 = arith.constant 0 : index
    %23 = vector.load %arg7[%c0_16, %c0_17] : memref<1x32xf32, #tpu.memory_space<vmem>>, vector<1x32xf32>
    %24 = vector.broadcast %23 : vector<1x32xf32> to vector<8x32xf32>
    %25 = arith.addf %22, %24 : vector<8x32xf32>
    %cst_18 = arith.constant 0.000000e+00 : f32
    %26 = vector.broadcast %cst_18 : f32 to vector<8x32xf32>
    %27 = arith.maximumf %25, %26 : vector<8x32xf32>
    %c0_19 = arith.constant 0 : index
    %c0_20 = arith.constant 0 : index
    %28 = vector.load %arg8[%c0_19, %c0_20] : memref<32x96xf32, #tpu.memory_space<vmem>>, vector<32x96xf32>
    %cst_21 = arith.constant dense<0.000000e+00> : vector<8x96xf32>
    %29 = tpu.matmul %27, %28, %cst_21 {dimension_numbers = #tpu.dot_dimension_numbers<[1], [0], [0], [1], [0, 0, 1, 1], [], []>} : vector<8x32xf32>, vector<32x96xf32>, vector<8x96xf32> -> vector<8x96xf32>
    %30 = vector.extract_strided_slice %29 {offsets = [0, 0], sizes = [8, 32], strides = [1, 1]} : vector<8x96xf32> to vector<8x32xf32>
    %31 = vector.extract_strided_slice %29 {offsets = [0, 32], sizes = [8, 32], strides = [1, 1]} : vector<8x96xf32> to vector<8x32xf32>
    %32 = vector.extract_strided_slice %29 {offsets = [0, 64], sizes = [8, 32], strides = [1, 1]} : vector<8x96xf32> to vector<8x32xf32>
    %33 = tpu.concatenate %30, %31, %32 in 0 : vector<8x32xf32>, vector<8x32xf32>, vector<8x32xf32> -> vector<24x32xf32>
    %c0_22 = arith.constant 0 : index
    %c0_23 = arith.constant 0 : index
    %34 = vector.load %arg9[%c0_22, %c0_23] : memref<4x24xf32, #tpu.memory_space<vmem>>, vector<4x24xf32>
    %cst_24 = arith.constant dense<0.000000e+00> : vector<4x32xf32>
    %35 = tpu.matmul %34, %33, %cst_24 {dimension_numbers = #tpu.dot_dimension_numbers<[1], [0], [0], [1], [0, 0, 1, 1], [], []>} : vector<4x24xf32>, vector<24x32xf32>, vector<4x32xf32> -> vector<4x32xf32>
    %c0_25 = arith.constant 0 : index
    %c0_26 = arith.constant 0 : index
    %36 = vector.load %arg10[%c0_25, %c0_26] : memref<1x32xf32, #tpu.memory_space<vmem>>, vector<1x32xf32>
    %37 = vector.broadcast %36 : vector<1x32xf32> to vector<4x32xf32>
    %38 = arith.addf %35, %37 : vector<4x32xf32>
    %cst_27 = arith.constant 0.000000e+00 : f32
    %39 = vector.broadcast %cst_27 : f32 to vector<4x32xf32>
    %40 = arith.maximumf %38, %39 : vector<4x32xf32>
    %c0_28 = arith.constant 0 : index
    %c0_29 = arith.constant 0 : index
    %41 = vector.load %arg11[%c0_28, %c0_29] : memref<32x48xf32, #tpu.memory_space<vmem>>, vector<32x48xf32>
    %cst_30 = arith.constant dense<0.000000e+00> : vector<4x48xf32>
    %42 = tpu.matmul %40, %41, %cst_30 {dimension_numbers = #tpu.dot_dimension_numbers<[1], [0], [0], [1], [0, 0, 1, 1], [], []>} : vector<4x32xf32>, vector<32x48xf32>, vector<4x48xf32> -> vector<4x48xf32>
    %43 = vector.extract_strided_slice %42 {offsets = [0, 0], sizes = [4, 16], strides = [1, 1]} : vector<4x48xf32> to vector<4x16xf32>
    %44 = vector.extract_strided_slice %42 {offsets = [0, 16], sizes = [4, 16], strides = [1, 1]} : vector<4x48xf32> to vector<4x16xf32>
    %45 = vector.extract_strided_slice %42 {offsets = [0, 32], sizes = [4, 16], strides = [1, 1]} : vector<4x48xf32> to vector<4x16xf32>
    %46 = tpu.concatenate %43, %44, %45 in 0 : vector<4x16xf32>, vector<4x16xf32>, vector<4x16xf32> -> vector<12x16xf32>
    %c0_31 = arith.constant 0 : index
    %c0_32 = arith.constant 0 : index
    %47 = vector.load %arg12[%c0_31, %c0_32] : memref<2x12xf32, #tpu.memory_space<vmem>>, vector<2x12xf32>
    %cst_33 = arith.constant dense<0.000000e+00> : vector<2x16xf32>
    %48 = tpu.matmul %47, %46, %cst_33 {dimension_numbers = #tpu.dot_dimension_numbers<[1], [0], [0], [1], [0, 0, 1, 1], [], []>} : vector<2x12xf32>, vector<12x16xf32>, vector<2x16xf32> -> vector<2x16xf32>
    %c0_34 = arith.constant 0 : index
    %c0_35 = arith.constant 0 : index
    %49 = vector.load %arg13[%c0_34, %c0_35] : memref<1x16xf32, #tpu.memory_space<vmem>>, vector<1x16xf32>
    %50 = vector.broadcast %49 : vector<1x16xf32> to vector<2x16xf32>
    %51 = arith.addf %48, %50 : vector<2x16xf32>
    %cst_36 = arith.constant 0.000000e+00 : f32
    %52 = vector.broadcast %cst_36 : f32 to vector<2x16xf32>
    %53 = arith.maximumf %51, %52 : vector<2x16xf32>
    %c0_37 = arith.constant 0 : index
    %c0_38 = arith.constant 0 : index
    %54 = vector.load %arg14[%c0_37, %c0_38] : memref<16x48xf32, #tpu.memory_space<vmem>>, vector<16x48xf32>
    %cst_39 = arith.constant dense<0.000000e+00> : vector<2x48xf32>
    %55 = tpu.matmul %53, %54, %cst_39 {dimension_numbers = #tpu.dot_dimension_numbers<[1], [0], [0], [1], [0, 0, 1, 1], [], []>} : vector<2x16xf32>, vector<16x48xf32>, vector<2x48xf32> -> vector<2x48xf32>
    %c0_40 = arith.constant 0 : index
    %c0_41 = arith.constant 0 : index
    %56 = vector.load %arg16[%c0_40, %c0_41] : memref<1x48xf32, #tpu.memory_space<vmem>>, vector<1x48xf32>
    %57 = vector.broadcast %56 : vector<1x48xf32> to vector<2x48xf32>
    %58 = arith.addf %55, %57 : vector<2x48xf32>
    %cst_42 = arith.constant 0.000000e+00 : f32
    %59 = vector.broadcast %cst_42 : f32 to vector<1x16xf32>
    %c0_43 = arith.constant 0 : index
    %c0_44 = arith.constant 0 : index
    %60 = vector.load %arg15[%c0_43, %c0_44] : memref<16x48xf32, #tpu.memory_space<vmem>>, vector<16x48xf32>
    %cst_45 = arith.constant dense<0.000000e+00> : vector<1x48xf32>
    %61 = tpu.matmul %59, %60, %cst_45 {dimension_numbers = #tpu.dot_dimension_numbers<[1], [0], [0], [1], [0, 0, 1, 1], [], []>} : vector<1x16xf32>, vector<16x48xf32>, vector<1x48xf32> -> vector<1x48xf32>
    %c0_46 = arith.constant 0 : index
    %c0_47 = arith.constant 0 : index
    %62 = vector.load %arg17[%c0_46, %c0_47] : memref<1x48xf32, #tpu.memory_space<vmem>>, vector<1x48xf32>
    %63 = arith.addf %61, %62 : vector<1x48xf32>
    %64 = vector.extract_strided_slice %58 {offsets = [0, 0], sizes = [1, 48], strides = [1, 1]} : vector<2x48xf32> to vector<1x48xf32>
    %65 = vector.extract_strided_slice %64 {offsets = [0, 0], sizes = [1, 16], strides = [1, 1]} : vector<1x48xf32> to vector<1x16xf32>
    %66 = vector.extract_strided_slice %63 {offsets = [0, 0], sizes = [1, 16], strides = [1, 1]} : vector<1x48xf32> to vector<1x16xf32>
    %67 = arith.addf %65, %66 : vector<1x16xf32>
    %68 = arith.negf %67 : vector<1x16xf32>
    %69 = math.exp %68 : vector<1x16xf32>
    %cst_48 = arith.constant 1.000000e+00 : f32
    %70 = vector.broadcast %cst_48 : f32 to vector<1x16xf32>
    %71 = arith.addf %70, %69 : vector<1x16xf32>
    %72 = arith.divf %70, %71 : vector<1x16xf32>
    %73 = vector.extract_strided_slice %64 {offsets = [0, 16], sizes = [1, 16], strides = [1, 1]} : vector<1x48xf32> to vector<1x16xf32>
    %74 = vector.extract_strided_slice %63 {offsets = [0, 16], sizes = [1, 16], strides = [1, 1]} : vector<1x48xf32> to vector<1x16xf32>
    %75 = arith.addf %73, %74 : vector<1x16xf32>
    %76 = arith.negf %75 : vector<1x16xf32>
    %77 = math.exp %76 : vector<1x16xf32>
    %cst_49 = arith.constant 1.000000e+00 : f32
    %78 = vector.broadcast %cst_49 : f32 to vector<1x16xf32>
    %79 = arith.addf %78, %77 : vector<1x16xf32>
    %80 = arith.divf %78, %79 : vector<1x16xf32>
    %81 = vector.extract_strided_slice %64 {offsets = [0, 32], sizes = [1, 16], strides = [1, 1]} : vector<1x48xf32> to vector<1x16xf32>
    %82 = vector.extract_strided_slice %63 {offsets = [0, 32], sizes = [1, 16], strides = [1, 1]} : vector<1x48xf32> to vector<1x16xf32>
    %83 = arith.mulf %72, %82 : vector<1x16xf32>
    %84 = arith.addf %81, %83 : vector<1x16xf32>
    %85 = math.tanh %84 : vector<1x16xf32>
    %cst_50 = arith.constant 1.000000e+00 : f32
    %86 = vector.broadcast %cst_50 : f32 to vector<1x16xf32>
    %87 = arith.subf %86, %80 : vector<1x16xf32>
    %88 = arith.mulf %87, %85 : vector<1x16xf32>
    %89 = arith.mulf %80, %59 : vector<1x16xf32>
    %90 = arith.addf %88, %89 : vector<1x16xf32>
    %c0_51 = arith.constant 0 : index
    %c0_52 = arith.constant 0 : index
    %91 = vector.load %arg15[%c0_51, %c0_52] : memref<16x48xf32, #tpu.memory_space<vmem>>, vector<16x48xf32>
    %cst_53 = arith.constant dense<0.000000e+00> : vector<1x48xf32>
    %92 = tpu.matmul %90, %91, %cst_53 {dimension_numbers = #tpu.dot_dimension_numbers<[1], [0], [0], [1], [0, 0, 1, 1], [], []>} : vector<1x16xf32>, vector<16x48xf32>, vector<1x48xf32> -> vector<1x48xf32>
    %c0_54 = arith.constant 0 : index
    %c0_55 = arith.constant 0 : index
    %93 = vector.load %arg17[%c0_54, %c0_55] : memref<1x48xf32, #tpu.memory_space<vmem>>, vector<1x48xf32>
    %94 = arith.addf %92, %93 : vector<1x48xf32>
    %95 = vector.extract_strided_slice %58 {offsets = [1, 0], sizes = [1, 48], strides = [1, 1]} : vector<2x48xf32> to vector<1x48xf32>
    %96 = vector.extract_strided_slice %95 {offsets = [0, 0], sizes = [1, 16], strides = [1, 1]} : vector<1x48xf32> to vector<1x16xf32>
    %97 = vector.extract_strided_slice %94 {offsets = [0, 0], sizes = [1, 16], strides = [1, 1]} : vector<1x48xf32> to vector<1x16xf32>
    %98 = arith.addf %96, %97 : vector<1x16xf32>
    %99 = arith.negf %98 : vector<1x16xf32>
    %100 = math.exp %99 : vector<1x16xf32>
    %cst_56 = arith.constant 1.000000e+00 : f32
    %101 = vector.broadcast %cst_56 : f32 to vector<1x16xf32>
    %102 = arith.addf %101, %100 : vector<1x16xf32>
    %103 = arith.divf %101, %102 : vector<1x16xf32>
    %104 = vector.extract_strided_slice %95 {offsets = [0, 16], sizes = [1, 16], strides = [1, 1]} : vector<1x48xf32> to vector<1x16xf32>
    %105 = vector.extract_strided_slice %94 {offsets = [0, 16], sizes = [1, 16], strides = [1, 1]} : vector<1x48xf32> to vector<1x16xf32>
    %106 = arith.addf %104, %105 : vector<1x16xf32>
    %107 = arith.negf %106 : vector<1x16xf32>
    %108 = math.exp %107 : vector<1x16xf32>
    %cst_57 = arith.constant 1.000000e+00 : f32
    %109 = vector.broadcast %cst_57 : f32 to vector<1x16xf32>
    %110 = arith.addf %109, %108 : vector<1x16xf32>
    %111 = arith.divf %109, %110 : vector<1x16xf32>
    %112 = vector.extract_strided_slice %95 {offsets = [0, 32], sizes = [1, 16], strides = [1, 1]} : vector<1x48xf32> to vector<1x16xf32>
    %113 = vector.extract_strided_slice %94 {offsets = [0, 32], sizes = [1, 16], strides = [1, 1]} : vector<1x48xf32> to vector<1x16xf32>
    %114 = arith.mulf %103, %113 : vector<1x16xf32>
    %115 = arith.addf %112, %114 : vector<1x16xf32>
    %116 = math.tanh %115 : vector<1x16xf32>
    %cst_58 = arith.constant 1.000000e+00 : f32
    %117 = vector.broadcast %cst_58 : f32 to vector<1x16xf32>
    %118 = arith.subf %117, %111 : vector<1x16xf32>
    %119 = arith.mulf %118, %116 : vector<1x16xf32>
    %120 = arith.mulf %111, %90 : vector<1x16xf32>
    %121 = arith.addf %119, %120 : vector<1x16xf32>
    %c0_59 = arith.constant 0 : index
    %c0_60 = arith.constant 0 : index
    %122 = vector.load %arg18[%c0_59, %c0_60] : memref<16x32xf32, #tpu.memory_space<vmem>>, vector<16x32xf32>
    %cst_61 = arith.constant dense<0.000000e+00> : vector<1x32xf32>
    %123 = tpu.matmul %121, %122, %cst_61 {dimension_numbers = #tpu.dot_dimension_numbers<[1], [0], [0], [1], [0, 0, 1, 1], [], []>} : vector<1x16xf32>, vector<16x32xf32>, vector<1x32xf32> -> vector<1x32xf32>
    %c0_62 = arith.constant 0 : index
    %c0_63 = arith.constant 0 : index
    %124 = vector.load %arg19[%c0_62, %c0_63] : memref<1x32xf32, #tpu.memory_space<vmem>>, vector<1x32xf32>
    %125 = arith.addf %123, %124 : vector<1x32xf32>
    %126 = vector.extract_strided_slice %125 {offsets = [0, 0], sizes = [1, 16], strides = [1, 1]} : vector<1x32xf32> to vector<1x16xf32>
    %c0_64 = arith.constant 0 : index
    %c0_65 = arith.constant 0 : index
    %127 = vector.load %arg20[%c0_64, %c0_65] : memref<16x32xf32, #tpu.memory_space<vmem>>, vector<16x32xf32>
    %cst_66 = arith.constant dense<0.000000e+00> : vector<1x32xf32>
    %128 = tpu.matmul %126, %127, %cst_66 {dimension_numbers = #tpu.dot_dimension_numbers<[1], [0], [0], [1], [0, 0, 1, 1], [], []>} : vector<1x16xf32>, vector<16x32xf32>, vector<1x32xf32> -> vector<1x32xf32>
    %c0_67 = arith.constant 0 : index
    %c0_68 = arith.constant 0 : index
    %129 = vector.load %arg21[%c0_67, %c0_68] : memref<1x32xf32, #tpu.memory_space<vmem>>, vector<1x32xf32>
    %130 = arith.addf %128, %129 : vector<1x32xf32>
    %131 = tpu.concatenate %130, %125, %126 in 1 : vector<1x32xf32>, vector<1x32xf32>, vector<1x16xf32> -> vector<1x80xf32>
    %c0_69 = arith.constant 0 : index
    %c0_70 = arith.constant 0 : index
    %c0_71 = arith.constant 0 : index
    %132 = vector.load %arg22[%c0_69, %c0_70, %c0_71] : memref<1x1x80xf32, #tpu.memory_space<vmem>>, vector<1x1x80xf32>
    %133 = vector.shape_cast %132 : vector<1x1x80xf32> to vector<1x80xf32>
    %134 = vector.shape_cast %131 : vector<1x80xf32> to vector<1x1x80xf32>
    tpu.vector_store %arg22[%c0_69, %c0_70, %c0_71], %134 {strides = array<i32>} : memref<1x1x80xf32, #tpu.memory_space<vmem>>, vector<1x1x80xf32>,
    return
  }
  func.func @transform_0(%arg0: i32) -> (i32, i32, i32) {
    %c0_i32 = arith.constant 0 : i32
    %c0_i32_0 = arith.constant 0 : i32
    %c0_i32_1 = arith.constant 0 : i32
    return %arg0, %c0_i32, %c0_i32_0 : i32, i32, i32
  }
  func.func @transform_1(%arg0: i32) -> (i32, i32) {
    %c0_i32 = arith.constant 0 : i32
    %c0_i32_0 = arith.constant 0 : i32
    %c0_i32_1 = arith.constant 0 : i32
    return %c0_i32, %c0_i32_0 : i32, i32
  }
  func.func @transform_2(%arg0: i32) -> (i32, i32) {
    %c0_i32 = arith.constant 0 : i32
    %c0_i32_0 = arith.constant 0 : i32
    %c0_i32_1 = arith.constant 0 : i32
    return %c0_i32, %c0_i32_0 : i32, i32
  }
  func.func @transform_3(%arg0: i32) -> (i32, i32) {
    %c0_i32 = arith.constant 0 : i32
    %c0_i32_0 = arith.constant 0 : i32
    %c0_i32_1 = arith.constant 0 : i32
    return %c0_i32, %c0_i32_0 : i32, i32
  }
  func.func @transform_4(%arg0: i32) -> (i32, i32) {
    %c0_i32 = arith.constant 0 : i32
    %c0_i32_0 = arith.constant 0 : i32
    %c0_i32_1 = arith.constant 0 : i32
    return %c0_i32, %c0_i32_0 : i32, i32
  }
  func.func @transform_5(%arg0: i32) -> (i32, i32) {
    %c0_i32 = arith.constant 0 : i32
    %c0_i32_0 = arith.constant 0 : i32
    %c0_i32_1 = arith.constant 0 : i32
    return %c0_i32, %c0_i32_0 : i32, i32
  }
  func.func @transform_6(%arg0: i32) -> (i32, i32) {
    %c0_i32 = arith.constant 0 : i32
    %c0_i32_0 = arith.constant 0 : i32
    %c0_i32_1 = arith.constant 0 : i32
    return %c0_i32, %c0_i32_0 : i32, i32
  }
  func.func @transform_7(%arg0: i32) -> (i32, i32) {
    %c0_i32 = arith.constant 0 : i32
    %c0_i32_0 = arith.constant 0 : i32
    %c0_i32_1 = arith.constant 0 : i32
    return %c0_i32, %c0_i32_0 : i32, i32
  }
  func.func @transform_8(%arg0: i32) -> (i32, i32) {
    %c0_i32 = arith.constant 0 : i32
    %c0_i32_0 = arith.constant 0 : i32
    %c0_i32_1 = arith.constant 0 : i32
    return %c0_i32, %c0_i32_0 : i32, i32
  }
  func.func @transform_9(%arg0: i32) -> (i32, i32) {
    %c0_i32 = arith.constant 0 : i32
    %c0_i32_0 = arith.constant 0 : i32
    %c0_i32_1 = arith.constant 0 : i32
    return %c0_i32, %c0_i32_0 : i32, i32
  }
  func.func @transform_10(%arg0: i32) -> (i32, i32) {
    %c0_i32 = arith.constant 0 : i32
    %c0_i32_0 = arith.constant 0 : i32
    %c0_i32_1 = arith.constant 0 : i32
    return %c0_i32, %c0_i32_0 : i32, i32
  }
  func.func @transform_11(%arg0: i32) -> (i32, i32) {
    %c0_i32 = arith.constant 0 : i32
    %c0_i32_0 = arith.constant 0 : i32
    %c0_i32_1 = arith.constant 0 : i32
    return %c0_i32, %c0_i32_0 : i32, i32
  }
  func.func @transform_12(%arg0: i32) -> (i32, i32) {
    %c0_i32 = arith.constant 0 : i32
    %c0_i32_0 = arith.constant 0 : i32
    %c0_i32_1 = arith.constant 0 : i32
    return %c0_i32, %c0_i32_0 : i32, i32
  }
  func.func @transform_13(%arg0: i32) -> (i32, i32) {
    %c0_i32 = arith.constant 0 : i32
    %c0_i32_0 = arith.constant 0 : i32
    %c0_i32_1 = arith.constant 0 : i32
    return %c0_i32, %c0_i32_0 : i32, i32
  }
  func.func @transform_14(%arg0: i32) -> (i32, i32) {
    %c0_i32 = arith.constant 0 : i32
    %c0_i32_0 = arith.constant 0 : i32
    %c0_i32_1 = arith.constant 0 : i32
    return %c0_i32, %c0_i32_0 : i32, i32
  }
  func.func @transform_15(%arg0: i32) -> (i32, i32) {
    %c0_i32 = arith.constant 0 : i32
    %c0_i32_0 = arith.constant 0 : i32
    %c0_i32_1 = arith.constant 0 : i32
    return %c0_i32, %c0_i32_0 : i32, i32
  }
  func.func @transform_16(%arg0: i32) -> (i32, i32) {
    %c0_i32 = arith.constant 0 : i32
    %c0_i32_0 = arith.constant 0 : i32
    %c0_i32_1 = arith.constant 0 : i32
    return %c0_i32, %c0_i32_0 : i32, i32
  }
  func.func @transform_17(%arg0: i32) -> (i32, i32) {
    %c0_i32 = arith.constant 0 : i32
    %c0_i32_0 = arith.constant 0 : i32
    %c0_i32_1 = arith.constant 0 : i32
    return %c0_i32, %c0_i32_0 : i32, i32
  }
  func.func @transform_18(%arg0: i32) -> (i32, i32) {
    %c0_i32 = arith.constant 0 : i32
    %c0_i32_0 = arith.constant 0 : i32
    %c0_i32_1 = arith.constant 0 : i32
    return %c0_i32, %c0_i32_0 : i32, i32
  }
  func.func @transform_19(%arg0: i32) -> (i32, i32) {
    %c0_i32 = arith.constant 0 : i32
    %c0_i32_0 = arith.constant 0 : i32
    %c0_i32_1 = arith.constant 0 : i32
    return %c0_i32, %c0_i32_0 : i32, i32
  }
  func.func @transform_20(%arg0: i32) -> (i32, i32) {
    %c0_i32 = arith.constant 0 : i32
    %c0_i32_0 = arith.constant 0 : i32
    %c0_i32_1 = arith.constant 0 : i32
    return %c0_i32, %c0_i32_0 : i32, i32
  }
  func.func @transform_21(%arg0: i32) -> (i32, i32, i32) {
    %c0_i32 = arith.constant 0 : i32
    %c0_i32_0 = arith.constant 0 : i32
    %c0_i32_1 = arith.constant 0 : i32
    return %arg0, %c0_i32, %c0_i32_0 : i32, i32, i32
  }
}

</mosaic_0001>

<bundles_post_ra>
// kernel: vae_gst_forward.1
= control target key start
LH: loop header
LB: loop body
LE: loop exit
PB: predicated region body
PF: predicated region fallthrough
CT: control target
= control target key end

     0   :  { %s2674_s0 = inlined_call_operand.vmem [shape: f32[2,32,64], index: 0, kind: input, shape index: {}]   ;;  %s2675_s1 = inlined_call_operand.vmem [shape: f32[64,192], index: 1, kind: input, shape index: {}]   ;;  %s2676_s2 = inlined_call_operand.vmem [shape: f32[16,96], index: 2, kind: input, shape index: {}]   ;;  %s2677_s3 = inlined_call_operand.vmem [shape: f32[1,64], index: 3, kind: input, shape index: {}]   ;;  %s2678_s4 = inlined_call_operand.vmem [shape: f32[64,96], index: 4, kind: input, shape index: {}]   ;;  %s2679_s5 = inlined_call_operand.vmem [shape: f32[8,48], index: 5, kind: input, shape index: {}]   ;;  %s2680_s6 = inlined_call_operand.vmem [shape: f32[1,32], index: 6, kind: input, shape index: {}]   ;;  %s2681_s7 = inlined_call_operand.vmem [shape: f32[32,96], index: 7, kind: input, shape index: {}]   ;;  %s2682_s8 = inlined_call_operand.vmem [shape: f32[4,24], index: 8, kind: input, shape index: {}]   ;;  %s2683_s9 = inlined_call_operand.vmem [shape: f32[1,32], index: 9, kind: input, shape index: {}]   ;;  %s2684_s10 = inlined_call_operand.vmem [shape: f32[32,48], index: 10, kind: input, shape index: {}]   ;;  %s2685_s11 = inlined_call_operand.vmem [shape: f32[2,12], index: 11, kind: input, shape index: {}]   ;;  %s2686_s12 = inlined_call_operand.vmem [shape: f32[1,16], index: 12, kind: input, shape index: {}]   ;;  %s2687_s13 = inlined_call_operand.vmem [shape: f32[16,48], index: 13, kind: input, shape index: {}]   ;;  %s2688_s14 = inlined_call_operand.vmem [shape: f32[16,48], index: 14, kind: input, shape index: {}]   ;;  %s2689_s15 = inlined_call_operand.vmem [shape: f32[1,48], index: 15, kind: input, shape index: {}]   ;;  %s2690_s16 = inlined_call_operand.vmem [shape: f32[1,48], index: 16, kind: input, shape index: {}]   ;;  %s2691_s17 = inlined_call_operand.vmem [shape: f32[16,32], index: 17, kind: input, shape index: {}]   ;;  %s2692_s18 = inlined_call_operand.vmem [shape: f32[1,32], index: 18, kind: input, shape index: {}]   ;;  %s2693_s19 = inlined_call_operand.vmem [shape: f32[16,32], index: 19, kind: input, shape index: {}]   ;;  %s2694_s20 = inlined_call_operand.vmem [shape: f32[1,32], index: 20, kind: input, shape index: {}]   ;;  %s2695_s21 = inlined_call_operand.vmem [shape: f32[2,1,80], index: 21, kind: output, shape index: {}]  }
   0x1   :  { %2701 = sst [smem:[#allocation2_spill]] %s2674_s0 }
   0x2   :  { %2702 = sst [smem:[#allocation3_spill]] %s2675_s1 }
   0x3   :  { %2703 = sst [smem:[#allocation4_spill]] %s2676_s2  ;;  %s2416_s2 = smov 0  }
   0x4   :  { %2704 = sst [smem:[#allocation5_spill]] %s2677_s3 }
   0x5   :  { %2705 = sst [smem:[#allocation6_spill]] %s2678_s4 }
   0x6   :  { %2706 = sst [smem:[#allocation7_spill]] %s2679_s5 }
   0x7 LB: > { %s1911_s25 = sadd.s32 4294967295, %s2296_s2   ;;  %p1915_p0 = scmp.ge.s32.totalorder %s2296_s2, 1  ;;  %s2296_s2 = sphi %s2416_s2, %s31_s2  }
   0x8   : > { %p587_p1 = scmp.lt.s32.totalorder %s2296_s2, 3 }
   0xa   : > { %p588_p2 = pnand %p1915_p0, %p587_p1 }
   0xb   : > { %s2707_s3 = sld [smem:[#allocation3_spill]] (!%p588_p2)  ;;  %v2298_v7 = vmov (!%p588_p2), 0.0   ;;  %p645_p3 = scmp.lt.s32.totalorder (!%p588_p2), %s1911_s25, 1  ;;  %vm673_vm0 = vcmask (!%p588_p2), 523264   ;;  %vm800_vm1 = vcmask (!%p588_p2), 785408   ;;  %vm2301_vm2 = vmmov (!%p588_p2), 0  }
   0xc   : > { %591 = sbr.rel (%p588_p2) target bundleno = 4004 (0xfa4), region = 104  ;;  %750 = vmatprep.mubr.f32.mxu0 (!%p588_p2), %v2298_v7  ;;  %s2708_s24 = sld [smem:[#allocation2_spill]] (!%p588_p2)  ;;  %vm995_vm3 = vcmask (!%p588_p2), 392192   ;;  %vm1074_vm4 = vcmask (!%p588_p2), 261120   ;;  %vm1163_vm5 = vcmask (!%p588_p2), 195584   ;;  %vm1322_vm6 = vcmask (!%p588_p2), 1043456  }
   0xd   : > { %s2699_s27 = smov (!%p588_p2), 64   ;;  %s2709_s0 = sld [smem:[#allocation4_spill]] (!%p588_p2)  ;;  %vm2304_vm7 = vmmov (!%p588_p2), 1   ;;  %vm1332_vm9 = vcmask (!%p588_p2), 97280   ;;  %vm1418_vm10 = vcmask (!%p588_p2), 130048   ;;  %vm1862_vm11 = vcmask (!%p588_p2), 647168  }
   0xe   : > { %s2710_s5 = sld [smem:[#allocation6_spill]] (!%p588_p2)  ;;  %s2711_s4 = sld [smem:[#allocation5_spill]] (!%p588_p2)  ;;  %vm2225_vm8 = vmpackc.low (!%p588_p2), %vm1322_vm6, %vm2304_vm7 }
   0xf   : > { %s2302_s1 = smov (!%p588_p2), 96   ;;  %s2713_s29 = sld [smem:[#allocation7_spill]] (!%p588_p2) }
  0x10   : > { %s2303_s28 = smov (!%p588_p2), 112   ;;  %s2305_s23 = smov (!%p588_p2), 32  }
  0x11   : > { %v658_v0 = vld [vmem:[%s2707_s3 + $0x8] sm:$0xff] (!%p588_p2)  ;;  %v660_v1 = vld [vmem:[%s2707_s3 + $0x18] sm:$0xff] (!%p588_p2)  ;;  %v657_v2 = vld [vmem:[%s2707_s3] sm:$0xff] (!%p588_p2) }
  0x12   : > { %v2143_v3 = vpack.c.bf16 (!%p588_p2), %v660_v1, %v658_v0  ;;  %v659_v4 = vld [vmem:[%s2707_s3 + $0x10] sm:$0xff] (!%p588_p2)  ;;  %v662_v5 = vld [vmem:[%s2707_s3 + $0x28] sm:$0xff] (!%p588_p2)  ;;  %v664_v6 = vld [vmem:[%s2707_s3 + $0x38] sm:$0xff] (!%p588_p2) }
  0x13   : > { %v2145_v8 = vpack.c.bf16 %v659_v4, %v657_v2  ;;  %v2147_v9 = vpack.c.bf16 %v664_v6, %v662_v5  ;;  %v661_v10 = vld [vmem:[%s2707_s3 + $0x20] sm:$0xff]  ;;  %v663_v11 = vld [vmem:[%s2707_s3 + $0x30] sm:$0xff]  ;;  %v666_v12 = vld [vmem:[%s2707_s3 + $0x48] sm:$0xff]  ;;  %s2715_s25 = smov (!%p645_p3, %s1911_s25), 1 }
  0x14   : > { %2144 = vmatprep.subr.bf16.mxu0 %v2143_v3  ;;  %v668_v13 = vld [vmem:[%s2707_s3 + $0x58] sm:$0xff]  ;;  %v2149_v14 = vpack.c.bf16 %v663_v11, %v661_v10  ;;  %v665_v16 = vld [vmem:[%s2707_s3 + $0x40] sm:$0xff]  ;;  %v667_v17 = vld [vmem:[%s2707_s3 + $0x50] sm:$0xff]  ;;  %s1945_s22 = sshll.u32 %s2715_s25, 5 }
  0x15   : > { %2146 = vmatpush1.bf16.msra.mxu0 %v2145_v8  ;;  %v2151_v15 = vpack.c.bf16 %v668_v13, %v666_v12  ;;  %v670_v18 = vld [vmem:[%s2707_s3 + $0x68] sm:$0xff]  ;;  %v672_v19 = vld [vmem:[%s2707_s3 + $0x78] sm:$0xff]  ;;  %v2153_v20 = vpack.c.bf16 %v667_v17, %v665_v16  ;;  %v669_v22 = vld [vmem:[%s2707_s3 + $0x60] sm:$0xff]  ;;  %s649_s26 = scalar_lea.vmem %s2708_s24, %s1945_s22  ;;  %s2712_s24 = smov 64  }
  0x16   : > { %2148 = vmatprep.subr.bf16.mxu0 %v2147_v9  ;;  %v2155_v21 = vpack.c.bf16 %v672_v19, %v670_v18  ;;  %v671_v23 = vld [vmem:[%s2707_s3 + $0x70] sm:$0xff]  ;;  %v653_v25 = vld [vmem:[%s649_s26] sm:$0xff]  ;;  %v654_v26 = vld [vmem:[%s649_s26 + $0x8] sm:$0xff]  ;;  %v2300_v9 = vmov 0.0|0.0   ;;  %s652_s22 = scalar_lea.vmem %s2695_s21, %s2715_s25 }
  0x17   : > { %v2157_v24 = vpack.c.bf16 %v671_v23, %v669_v22  ;;  %v655_v27 = vld [vmem:[%s649_s26 + $0x10] sm:$0xff]  ;;  %v656_v28 = vld [vmem:[%s649_s26 + $0x18] sm:$0xff]  ;;  %v791_v43 = vld [vmem:[%s2709_s0] sm:$0xff] }
  0x18   : > { %2033 = vmatprep.mubr.msk.f32.mxu1 %vm800_vm1, %v791_v43  ;;  %v884_v44 = vld [vmem:[%s2710_s5] sm:$0xff]  ;;  %v885_v45 = vld [vmem:[%s2710_s5 + $0x8] sm:$0xff]  ;;  %v886_v46 = vld [vmem:[%s2710_s5 + $0x10] sm:$0xff] }
  0x19   : > { %2150 = vmatpush1.bf16.msra.mxu0 %v2149_v14  ;;  %v2183_v47 = vpack.c.bf16 %v885_v45, %v884_v44  ;;  %v887_v48 = vld [vmem:[%s2710_s5 + $0x18] sm:$0xff]  ;;  %v888_v50 = vld [vmem:[%s2710_s5 + $0x20] sm:$0xff]  ;;  %v889_v51 = vld [vmem:[%s2710_s5 + $0x28] sm:$0xff] }
  0x1a   : > { %2152 = vmatprep.subr.bf16.mxu0 %v2151_v15  ;;  %v2187_v49 = vpack.c.bf16 %v887_v48, %v886_v46  ;;  %v2191_v52 = vpack.c.bf16 %v889_v51, %v888_v50  ;;  %v792_v61 = vld [vmem:[%s2709_s0 + $0x8] sm:$0xff]  ;;  %v890_v62 = vld [vmem:[%s2710_s5 + $0x30] sm:$0xff]  ;;  %v891_v63 = vld [vmem:[%s2710_s5 + $0x38] sm:$0xff] }
  0x1b   : > { %v2195_v0 = vpack.c.bf16 %v891_v63, %v890_v62  ;;  %v1922_v1 = vld [vmem:[%s2711_s4] ss:$0 sm:$0xff]  ;;  %v1071_v15 = vld [vmem:[%s2681_s7 + $0x8] sm:$0xff]  ;;  %v1240_v43 = vld [vmem:[%s2684_s10 + $0x10] sm:$0xff] }
  0x1c   : > { %v1070_v14 = vld [vmem:[%s2681_s7] sm:$0xff]  ;;  %v1241_v44 = vld [vmem:[%s2684_s10 + $0x18] sm:$0xff]  ;;  %v1410_v63 = vld [vmem:[%s2687_s13 + $0x8] sm:$0xff] }
  0x1d   : > { %2154 = vmatpush1.bf16.msra.mxu0 %v2153_v20  ;;  %v2209_v16 = vpack.c.bf16 %v1071_v15, %v1070_v14  ;;  %v2221_v45 = vpack.c.bf16 %v1241_v44, %v1240_v43  ;;  %v1930_v46 = vld [vmem:[%s2683_s9] ss:$0 sm:$0xff]  ;;  %v1700_v44 = vld [vmem:[%s2691_s17 + $0x8] sm:$0xff] }
  0x1e   : > { %2156 = vmatprep.subr.bf16.mxu0 %v2155_v21  ;;  %v1492_v51 = vld [vmem:[%s2688_s14] sm:$0xff] }
  0x1f   : > { %v1409_v62 = vld [vmem:[%s2687_s13] sm:$0xff] }
  0x21   : > { %2158 = vmatpush1.bf16.msra.mxu0 %v2157_v24 }
  0x22   : > { %2184 = vmatprep.subr.bf16.mxu0 %v2183_v47 }
  0x24   : > { %1918 = vmatmul.mubr.msk.f32.vlgmr.msra.gmra.mrb[0].mxu0 %vm673_vm0, %v653_v25  ;;  %v987_v25 = vld [vmem:[%s2713_s29] sm:$0xff] }
  0x25   : > { %756 = vmatprep.mubr.f32.mxu0 %v2298_v7  ;;  %2186 = vmatpush3.bf16.msra.mxu0 %v2183_v47 }
  0x26   : > { %2188 = vmatprep.subr.bf16.mxu0 %v2187_v49 }
  0x28   : > { %1919 = vmatmul.mubr.msk.f32.gmra.mrb[2].mxu0 %vm673_vm0, %v654_v26  ;;  %v1072_v26 = vld [vmem:[%s2681_s7 + $0x10] sm:$0xff] }
  0x29   : > { %762 = vmatprep.mubr.f32.mxu0 %v2298_v7  ;;  %2190 = vmatpush3.bf16.msra.mxu0 %v2187_v49 }
  0x2a   : > { %2192 = vmatprep.subr.bf16.mxu0 %v2191_v52 }
  0x2c   : > { %1920 = vmatmul.mubr.msk.f32.gmra.mrb[4].mxu0 %vm673_vm0, %v655_v27  ;;  %v1073_v27 = vld [vmem:[%s2681_s7 + $0x18] sm:$0xff] }
  0x2d   : > { %768 = vmatprep.mubr.f32.mxu0 %v2298_v7  ;;  %2194 = vmatpush3.bf16.msra.mxu0 %v2191_v52  ;;  %v1493_v52 = vld [vmem:[%s2688_s14 + $0x8] sm:$0xff] }
  0x2e   : > { %2196 = vmatprep.subr.bf16.mxu0 %v2195_v0 }
  0x30   : > { %1921 = vmatmul.mubr.msk.f32.gmra.mrb[6].mxu0 %vm673_vm0, %v656_v28  ;;  %v2212_v28 = vpack.c.bf16 %v1073_v27, %v1072_v26 }
  0x31   : > { %2198 = vmatpush3.bf16.msra.mxu0 %v2195_v0  ;;  %v2228_v0 = vpack.c.bf16 %v1410_v63, %v1409_v62  ;;  %v1780_v62 = vld [vmem:[%s2694_s20] sm:$0x1] }
  0x32   : > { %2208 = vmatprep.subr.bf16.mxu0 %v2300_v9 }
  0xf7   : > { %v752_v29 = vpop.f32.mrb[0].mxu0 }
  0xf8   : > { %v754_v30 = vpop.f32.mrb[1].mxu0 }
  0xfb   : > { %v758_v31 = vpop.f32.mrb[2].mxu0 }
  0xfc   : > { %v760_v32 = vpop.f32.mrb[3].mxu0  ;;  %v2258_v33 = vpack.i.bf16 %v758_v31, %v752_v29  ;;  %v2159_v34 = vpack.c.bf16 %v758_v31, %v752_v29  ;;  %v1927_v29 = vld [vmem:[%s2680_s6] ss:$0 sm:$0xff] }
  0xfd   : > { %v2175_v35 = vpack.c.bf16 %v760_v32, %v754_v30 }
  0xfe   : > { %2259 = vrot.lane.b32.xlu0 %v2258_v33, %s2699_s27  ;;  %2160 = vmatprep.subr.bf16.mxu1 %v2159_v34 }
  0xff   : > { %v764_v36 = vpop.f32.mrb[4].mxu0  ;;  %2162 = vmatpush3.bf16.msra.mxu1 %v2159_v34  ;;  %v1238_v34 = vld [vmem:[%s2684_s10] sm:$0xff] }
 0x100   : > { %v766_v37 = vpop.f32.mrb[5].mxu0 }
 0x103   : > { %v770_v38 = vpop.f32.mrb[6].mxu0 }
 0x104   : > { %v2263_v39 = vpack.i.bf16 %v770_v38, %v764_v36  ;;  %v2163_v40 = vpack.c.bf16 %v770_v38, %v764_v36  ;;  %v772_v41 = vpop.f32.mrb[7].mxu0 }
 0x105   : > { %v2179_v42 = vpack.c.bf16 %v772_v41, %v766_v37  ;;  %v1155_v41 = vld [vmem:[%s2682_s8] sm:$0xf] }
 0x106   : > { %2264 = vrot.lane.b32.xlu0 %v2263_v39, %s2699_s27  ;;  %2164 = vmatprep.subr.bf16.mxu1 %v2163_v40 }
 0x107   : > { %2166 = vmatpush3.bf16.msra.mxu1 %v2163_v40 }
 0x170   : > { %v2260_v53 = vpop.permute.xlu0 %2259 }
 0x171   : > { %v2262_v54 = vunpack.i.h.bf16 %v2260_v53  ;;  %v2261_v55 = vunpack.i.l.bf16 %v2260_v53  ;;  %v2231_v53 = vpack.c.bf16 %v1493_v52, %v1492_v51 }
 0x173   : > { %v2167_v56 = vpack.c.bf16 %v2262_v54, %v2261_v55 }
 0x175   : > { %2168 = vmatprep.subr.bf16.mxu1 %v2167_v56 }
 0x176   : > { %2170 = vmatpush3.bf16.msra.mxu1 %v2167_v56 }
 0x178   : > { %v2265_v57 = vpop.permute.xlu0 %2264 }
 0x179   : > { %v2267_v58 = vunpack.i.h.bf16 %v2265_v57  ;;  %v2266_v59 = vunpack.i.l.bf16 %v2265_v57 }
 0x17b   : > { %v2171_v60 = vpack.c.bf16 %v2267_v58, %v2266_v59 }
 0x17d   : > { %2172 = vmatprep.subr.bf16.mxu1 %v2171_v60 }
 0x17e   : > { %2174 = vmatpush3.bf16.msra.mxu1 %v2171_v60 }
 0x17f   : > { %2176 = vmatprep.subr.bf16.mxu1 %v2175_v35 }
 0x182   : > { %2178 = vmatpush3.bf16.msra.mxu1 %v2175_v35  ;;  %v1239_v35 = vld [vmem:[%s2684_s10 + $0x8] sm:$0xff] }
 0x183   : > { %2180 = vmatprep.subr.bf16.mxu1 %v2179_v42  ;;  %v2218_v36 = vpack.c.bf16 %v1239_v35, %v1238_v34 }
 0x186   : > { %2182 = vmatpush3.bf16.msra.mxu1 %v2179_v42 }
 0x187   : > { %2199 = vmatprep.subr.bf16.mxu1 %v2300_v9 }
 0x189   : > { %2034 = vmatmul.mubr.msk.f32.vlgmr.msra.gmra.mrb[0].mxu1 %vm800_vm1, %v792_v61  ;;  %v1324_v61 = vld [vmem:[%s2685_s11] sm:$0x3] }
 0x18a   : > { %2067 = vmatprep.mubr.msk.f32.mxu1 %vm2301_vm2, %v2298_v7 }
 0x25c   : > { %v2035_v2 = vpop.f32.mrb[0].mxu1 }
 0x25d   : > { %v879_v3 = vadd.f32 %v2035_v2, %v1922_v1  ;;  %v873_v4 = vpop.f32.mrb[1].mxu1 }
 0x25e   : > { %v874_v5 = vadd.f32 %v1922_v1, %v873_v4  ;;  %v1494_v1 = vld [vmem:[%s2690_s16] sm:$0x1] }
 0x25f   : > { %v883_v8 = vmax.f32 %v879_v3, 0.0 }
 0x260   : > { %v882_v6 = vmax.f32 %v874_v5, 0.0  ;;  %v1933_v5 = vld [vmem:[%s2686_s12] ss:$0 sm:$0xff] }
 0x262   : > { %2052 = vmatprep.mubr.msk.f32.mxu0 %vm673_vm0, %v882_v6 }
 0x263   : > { %2053 = vmatmul.mubr.msk.f32.vlgmr.msra.gmra.mrb[8].mxu0 %vm673_vm0, %v883_v8 }
 0x264   : > { %2078 = vmatprep.mubr.msk.f32.mxu0 %vm2301_vm2, %v2298_v7  ;;  %2210 = vmatpush3.bf16.msra.mxu0 %v2209_v16 }
 0x265   : > { %2211 = vmatprep.subr.bf16.mxu0 %v2300_v9 }
 0x268   : > { %2213 = vmatpush3.bf16.msra.mxu0 %v2212_v28 }
 0x269   : > { %2217 = vmatprep.subr.bf16.mxu0 %v2300_v9 }
 0x336   : > { %v2054_v10 = vpop.f32.mrb[8].mxu0 }
 0x337   : > { %v964_v11 = vpop.f32.mrb[9].mxu0 }
 0x338   : > { %v2273_v12 = vpack.i.bf16 %v2054_v10, %v964_v11  ;;  %v2200_v13 = vpack.c.bf16 %v2054_v10, %v964_v11 }
 0x33a   : > { %2269 = vrot.lane.b32.xlu1 %v2273_v12, %s2302_s1  ;;  %2201 = vmatpush3.bf16.msra.mxu1 %v2200_v13 }
 0x33b   : > { %2202 = vmatprep.subr.bf16.mxu1 %v2300_v9 }
 0x33e   : > { %2274 = vrot.lane.b32.xlu1 %v2273_v12, %s2712_s24  ;;  %v1936_v12 = vld [vmem:[%s2689_s15] ss:$0 sm:$0xff] }
 0x3ac   : > { %v2270_v17 = vpop.permute.xlu1 %2269 }
 0x3ad   : > { %v2272_v18 = vunpack.i.h.bf16 %v2270_v17  ;;  %v2271_v19 = vunpack.i.l.bf16 %v2270_v17 }
 0x3af   : > { %v2203_v20 = vpack.c.bf16 %v2272_v18, %v2271_v19 }
 0x3b0   : > { %v2275_v21 = vpop.permute.xlu1 %2274 }
 0x3b1   : > { %v2277_v22 = vunpack.i.h.bf16 %v2275_v21  ;;  %v2276_v23 = vunpack.i.l.bf16 %v2275_v21  ;;  %2204 = vmatpush3.bf16.msra.mxu1 %v2203_v20 }
 0x3b2   : > { %2205 = vmatprep.subr.bf16.mxu1 %v2300_v9 }
 0x3b3   : > { %v2206_v24 = vpack.c.bf16 %v2277_v22, %v2276_v23 }
 0x3b5   : > { %2207 = vmatpush3.bf16.msra.mxu1 %v2206_v24 }
 0x3b6   : > { %2214 = vmatprep.subr.bf16.mxu1 %v2300_v9 }
 0x3b8   : > { %2068 = vmatmul.mubr.msk.f32.vlgmr.msra.gmra.mrb[2].mxu1 %vm995_vm3, %v987_v25 }
 0x3b9   : > { %2087 = vmatprep.mubr.msk.f32.mxu1 %vm2301_vm2, %v2298_v7 }
 0x48b   : > { %v1065_v30 = vpop.f32.mrb[2].mxu1 }
 0x48c   : > { %v1066_v31 = vadd.f32 %v1927_v29, %v1065_v30  ;;  %v2069_v32 = vpop.f32.mrb[3].mxu1 }
 0x48e   : > { %v1069_v33 = vmax.f32 %v1066_v31, 0.0 }
 0x490   : > { %2079 = vmatmul.mubr.msk.f32.vlgmr.msra.gmra.mrb[10].mxu0 %vm1074_vm4, %v1069_v33 }
 0x491   : > { %2098 = vmatprep.mubr.msk.f32.mxu0 %vm2301_vm2, %v2298_v7  ;;  %2219 = vmatpush3.bf16.msra.mxu0 %v2218_v36 }
 0x492   : > { %2220 = vmatprep.subr.bf16.mxu0 %v2300_v9 }
 0x495   : > { %2222 = vmatpush3.bf16.msra.mxu0 %v2221_v45 }
 0x496   : > { %2230 = vmatprep.subr.bf16.mxu0 %v2300_v9 }
 0x563   : > { %v1144_v37 = vpop.f32.mrb[10].mxu0 }
 0x564   : > { %1152 = vrot.lane.b32.xlu1 %v1144_v37, %s2712_s24  ;;  %1149 = vrot.lane.b32.xlu0 %v1144_v37, %s2302_s1  ;;  %v2080_v38 = vpop.f32.mrb[11].mxu0 }
 0x5d6   : > { %v1150_v39 = vpop.permute.xlu0 %1149  ;;  %v1153_v42 = vpop.permute.xlu1 %1152 }
 0x5d7   : > { %v2215_v40 = vpack.c.bf16 %v1150_v39, %v1144_v37 }
 0x5d9   : > { %2216 = vmatpush3.bf16.msra.mxu1 %v2215_v40 }
 0x5da   : > { %2085 = vmatprep.subr.mxu1 %v2298_v7 }
 0x5dd   : > { %2086 = vmatpush3.msra.mxu1 %v1153_v42 }
 0x5de   : > { %2088 = vmatmul.mubr.msk.f32.vlgmr.msra.gmra.mrb[4].mxu1 %vm1163_vm5, %v1155_v41  ;;  %2223 = vmatprep.subr.bf16.mxu1 %v2300_v9 }
 0x5df   : > { %2105 = vmatprep.mubr.msk.f32.mxu1 %vm2301_vm2, %v2298_v7 }
 0x6b1   : > { %v1233_v47 = vpop.f32.mrb[4].mxu1 }
 0x6b2   : > { %v1234_v48 = vadd.f32 %v1930_v46, %v1233_v47  ;;  %v2089_v49 = vpop.f32.mrb[5].mxu1 }
 0x6b4   : > { %v1237_v50 = vmax.f32 %v1234_v48, 0.0 }
 0x6b6   : > { %2099 = vmatmul.mubr.msk.f32.vlgmr.msra.gmra.mrb[12].mxu0 %vm1074_vm4, %v1237_v50 }
 0x6b7   : > { %2119 = vmatprep.mubr.msk.f32.mxu0 %vm2301_vm2, %v2298_v7  ;;  %2232 = vmatpush3.bf16.msra.mxu0 %v2231_v53 }
 0x6b8   : > { %2236 = vmatprep.subr.bf16.mxu0 %v2300_v9 }
 0x6ba   : > { %2120 = vmatmul.mubr.f32.vlgmr.msra.gmra.mrb[14].mxu0 %v2298_v7 }
 0x6bb   : > { %2133 = vmatprep.mubr.msk.f32.mxu0 %vm2301_vm2, %v2298_v7 }
 0x789   : > { %v1311_v54 = vpop.f32.mrb[12].mxu0 }
 0x78a   : > { %v1316_v55 = vrot.slane %v1311_v54, 4  ;;  %1320 = vrot.lane.b32.xlu1 %v1311_v54, %s2302_s1  ;;  %v2100_v56 = vpop.f32.mrb[13].mxu0 }
 0x78b   : > { %v1779_v56 = vld [vmem:[%s2693_s19 + $0x8] sm:$0xff] }
 0x78c   : > { %1317 = vrot.lane.b32.xlu0 %v1316_v55, %s2303_s28  ;;  %v1778_v55 = vld [vmem:[%s2693_s19] sm:$0xff] }
 0x78d   : > { %v1564_v2 = vpop.f32.mrb[14].mxu0 }
 0x78e   : > { %v1565_v3 = vadd.f32 %v1564_v2, %v1494_v1  ;;  %v2121_v4 = vpop.f32.mrb[15].mxu0 }
 0x790   : > { %1576 = vrot.lane.b32.xlu0 %v1565_v3, %s2302_s1 }
 0x7fc   : > { %v1321_v58 = vpop.permute.xlu1 %1320 }
 0x7fe   : > { %v1318_v57 = vpop.permute.xlu0 %1317 }
 0x7ff   : > { %v1323_v59 = vsel %vm1322_vm6, %v1311_v54, %v1318_v57  ;;  %v2240_v57 = vpack.c.bf16 %v1779_v56, %v1778_v55 }
 0x800   : > { %v2224_v60 = vpack.c.bf16 %v1321_v58, %v1323_v59  ;;  %v1701_v58 = vld [vmem:[%s2692_s18] sm:$0x1] }
 0x802   : > { %2226 = vmatpush3.bf16.msk.msra.mxu1 %vm2225_vm8, %v2224_v60  ;;  %v1577_v20 = vpop.permute.xlu0 %1576 }
 0x803   : > { %2227 = vmatprep.subr.bf16.mxu1 %v2300_v9 }
 0x805   : > { %2106 = vmatmul.mubr.msk.f32.vlgmr.msra.gmra.mrb[6].mxu1 %vm1332_vm9, %v1324_v61 }
 0x806   : > { %2112 = vmatprep.mubr.msk.f32.mxu1 %vm2301_vm2, %v2298_v7  ;;  %2229 = vmatpush3.bf16.msra.mxu1 %v2228_v0 }
 0x807   : > { %2233 = vmatprep.subr.bf16.mxu1 %v2300_v9 }
 0x8d8   : > { %v1404_v6 = vpop.f32.mrb[6].mxu1 }
 0x8d9   : > { %v1405_v8 = vadd.f32 %v1933_v5, %v1404_v6  ;;  %v2107_v10 = vpop.f32.mrb[7].mxu1 }
 0x8db   : > { %v1408_v11 = vmax.f32 %v1405_v8, 0.0 }
 0x8dd   : > { %2113 = vmatmul.mubr.msk.f32.vlgmr.msra.gmra.mrb[8].mxu1 %vm1418_vm10, %v1408_v11 }
 0x8de   : > { %2235 = vmatpush3.bf16.msra.mxu1 %v2231_v53  ;;  %2126 = vmatprep.mubr.msk.f32.mxu1 %vm2301_vm2, %v2298_v7 }
 0x8df   : > { %2239 = vmatprep.subr.bf16.mxu1 %v2300_v9 }
 0x9b0   : > { %v1488_v13 = vpop.f32.mrb[8].mxu1 }
 0x9b1   : > { %v1489_v14 = vadd.f32 %v1936_v12, %v1488_v13  ;;  %v2114_v15 = vpop.f32.mrb[9].mxu1 }
 0x9b3   : > { %v1568_v16 = vadd.f32 %v1565_v3, %v1489_v14 }
 0x9b5   : > { %v1938_v17 = vmul.f32 -1.442695, %v1568_v16 }
 0x9b7   : > { %2278 = vpow2.f32 %v1938_v17 }
 0x9c1   : > { %v2279_v18 = vpop.eup %2278 }
 0x9c2   : > { %v1572_v19 = vadd.f32 1.0, %v2279_v18 }
 0x9c4   : > { %2280 = vrcp.f32 %v1572_v19 }
 0x9ce   : > { %v2281_v21 = vpop.eup %2280 }
 0x9cf   : > { %v1579_v22 = vmul.f32 %v2281_v21, %v1577_v20  ;;  %v1586_v25 = vsub.f32 1.0, %v2281_v21  ;;  %v1592_v27 = vmul.f32 0.0, %v2281_v21 }
 0x9d1   : > { %1581 = vrot.lane.b32.xlu1 %v1579_v22, %s2305_s23 }
 0xa43   : > { %v1582_v9 = vpop.permute.xlu1 %1581 }
 0xa44   : > { %v1584_v23 = vadd.f32 %v1582_v9, %v1489_v14 }
 0xa46   : > { %2282 = vtanh.f32 %v1584_v23 }
 0xa50   : > { %v2283_v24 = vpop.eup %2282 }
 0xa51   : > { %1588 = vrot.lane.b32.xlu0 %v2283_v24, %s2303_s28 }
 0xac3   : > { %v1589_v26 = vpop.permute.xlu0 %1588 }
 0xac4   : > { %v1591_v28 = vmul.f32 %v1589_v26, %v1586_v25 }
 0xac6   : > { %v1593_v29 = vadd.f32 %v1592_v27, %v1591_v28 }
 0xac8   : > { %1595 = vrot.lane.b32.xlu1 %v1593_v29, %s2303_s28  ;;  %v1695_v47 = vrot.slane %v1593_v29, 7 }
 0xb3a   : > { %v1596_v30 = vpop.permute.xlu1 %1595 }
 0xb3b   : > { %2127 = vmatmul.mubr.msk.f32.vlgmr.msra.gmra.mrb[10].mxu1 %vm1418_vm10, %v1596_v30 }
 0xb3c   : > { %2140 = vmatprep.mubr.msk.f32.mxu1 %vm2301_vm2, %v2298_v7  ;;  %v1699_v7 = vld [vmem:[%s2691_s17] sm:$0xff]  ;;  %2241 = vmatpush3.bf16.msra.mxu1 %v2240_v57 }
 0xb3d   : > { %v2237_v45 = vpack.c.bf16 %v1700_v44, %v1699_v7 }
 0xb3f   : > { %2238 = vmatpush3.bf16.msra.mxu0 %v2237_v45 }
 0xc0e   : > { %v1665_v31 = vpop.f32.mrb[10].mxu1 }
 0xc0f   : > { %v1666_v32 = vadd.f32 %v1665_v31, %v1494_v1  ;;  %v2128_v33 = vpop.f32.mrb[11].mxu1 }
 0xc11   : > { %v1670_v34 = vrot.slane %v1666_v32, 7 }
 0xc13   : > { %1679 = vrot.lane.b32.xlu0 %v1670_v34, %s2302_s1  ;;  %v1672_v35 = vadd.f32 %v1670_v34, %v1489_v14 }
 0xc15   : > { %v1940_v36 = vmul.f32 -1.442695, %v1672_v35 }
 0xc17   : > { %2284 = vpow2.f32 %v1940_v36 }
 0xc21   : > { %v2285_v37 = vpop.eup %2284 }
 0xc22   : > { %v1676_v38 = vadd.f32 1.0, %v2285_v37 }
 0xc24   : > { %2286 = vrcp.f32 %v1676_v38 }
 0xc2e   : > { %v2287_v39 = vpop.eup %2286 }
 0xc2f   : > { %v1689_v48 = vsub.f32 1.0, %v2287_v39  ;;  %v1697_v50 = vmul.f32 %v2287_v39, %v1695_v47 }
 0xc85   : > { %v1680_v40 = vpop.permute.xlu0 %1679 }
 0xc86   : > { %v1682_v41 = vmul.f32 %v2287_v39, %v1680_v40 }
 0xc88   : > { %1684 = vrot.lane.b32.xlu1 %v1682_v41, %s2305_s23 }
 0xcfa   : > { %v1685_v42 = vpop.permute.xlu1 %1684 }
 0xcfb   : > { %v1687_v43 = vadd.f32 %v1685_v42, %v1489_v14 }
 0xcfd   : > { %2288 = vtanh.f32 %v1687_v43 }
 0xd07   : > { %v2289_v46 = vpop.eup %2288 }
 0xd08   : > { %1691 = vrot.lane.b32.xlu0 %v2289_v46, %s2303_s28 }
 0xd7a   : > { %v1692_v49 = vpop.permute.xlu0 %1691 }
 0xd7b   : > { %v1694_v51 = vmul.f32 %v1692_v49, %v1689_v48 }
 0xd7d   : > { %v1698_v52 = vadd.f32 %v1697_v50, %v1694_v51 }
 0xd7f   : > { %v1703_v53 = vrot.slane %v1698_v52, 1 }
 0xd81   : > { %1704 = vrot.lane.b32.xlu1 %v1703_v53, %s2303_s28 }
 0xdf3   : > { %v1705_v54 = vpop.permute.xlu1 %1704 }
 0xdf4   : > { %2134 = vmatmul.mubr.msk.f32.vlgmr.msra.gmra.mrb[16].mxu0 %vm1418_vm10, %v1705_v54 }
 0xec7   : > { %v1774_v59 = vpop.f32.mrb[16].mxu0 }
 0xec8   : > { %v1775_v60 = vadd.f32 %v1774_v59, %v1701_v58  ;;  %v2135_v61 = vpop.f32.mrb[17].mxu0 }
 0xeca   : > { %1857 = vrot.lane.b32.xlu1 %v1775_v60, %s2712_s24  ;;  %1854 = vrot.lane.b32.xlu0 %v1775_v60, %s2305_s23 }
 0xecb   : > { %2141 = vmatmul.mubr.msk.f32.vlgmr.msra.gmra.mrb[12].mxu1 %vm1418_vm10, %v1775_v60 }
 0xf3c   : > { %v1855_v2 = vpop.permute.xlu0 %1854  ;;  %v1858_v3 = vpop.permute.xlu1 %1857 }
 0xf9e   : > { %v1850_v63 = vpop.f32.mrb[12].mxu1 }
 0xf9f   : > { %v1851_v0 = vadd.f32 %v1850_v63, %v1780_v62  ;;  %v2142_v1 = vpop.f32.mrb[13].mxu1 }
 0xfa1   : > { %v1860_v4 = vsel %vm1074_vm4, %v1851_v0, %v1855_v2 }
 0xfa2   : > { %v1861_v5 = vsel %vm673_vm0, %v1860_v4, %v1858_v3 }
 0xfa3   : > { %1863 = vst.msk [vmem:[%s652_s22] sm:$0x1] %vm1862_vm11, %v1861_v5 }
 0xfa4 PF: > { %s31_s2 = sadd.s32 1, %s2296_s2  }
 0xfa5   : > { %p28_p4 = scmp.ge.s32.totalorder %s31_s2, 4  }
 0xfa7   :  { %30 = sbr.rel (!%p28_p4) target bundleno = 7 (0x7), region = 134 }

</bundles_post_ra>
